<compile_context>
chip_gen: v7x
topology: tpu7x:2x2x1
jax: 0.10.0
libtpu: 0.0.40
codegen_flags: <defaults>
</compile_context>

<pallas_src>
import functools

import jax
import jax.numpy as jnp
from jax.experimental import pallas as pl
from jax.experimental.pallas import tpu as pltpu


# ----------------------------- fused Pallas kernel -------------------------- #

def _fused_kernel(x_ref, w1_ref, b1_ref, w2_ref, b2_ref, o_ref, u_ref,
                  *, kh_taps, ho_rows):
    """One batch item per grid step.

    x_ref : (1, H, LX)              image rows, lane = w*Cin + ci (zero-padded to LX)
    w1_ref: (KH*LX, W*Cmid)         stage-1 block-Toeplitz weights (bn scale folded)
    b1_ref: (1, W*Cmid)             stage-1 bn shift, tiled per w
    w2_ref: (KH*(LX+W*Cmid), W*Cout)stage-2 weights over the [x || a] slabs
    b2_ref: (1, W*Cout)             stage-2 bn shift (t1 + t2), tiled per w
    o_ref : (1, Ho, W*Cout)         lane-dense output (wrap cols sliced by wrapper)
    u_ref : (H, LX + W*Cmid)        VMEM scratch holding [x-slab || a-slab]
    """
    h_img = x_ref.shape[1]
    lx = x_ref.shape[2]
    la = u_ref.shape[1] - lx

    xv = x_ref[0]                                                    # (H, LX)

    # -- stage 1: a = relu(conv(x)*s0 + t0) as ONE block-Toeplitz dot --------
    lhs1 = jnp.concatenate([xv[k:k + ho_rows, :] for k in range(kh_taps)],
                           axis=1)                                   # (Ho, KH*LX)
    a1 = jnp.maximum(
        jnp.dot(lhs1, w1_ref[...], preferred_element_type=jnp.float32)
        + b1_ref[...], 0.0)                                          # (Ho, W*Cmid)

    # -- build combined stage-2 image u = [x-slab || a-slab] -----------------
    # a-slab rows 0 / H-1 are conv1's zero halo (pad=1).  The +1 column shift
    # of that padding and the masking of a's wrap columns (w >= Wo) are folded
    # into zero entries of w2, so a1 is stored as-is.
    u_ref[:, pl.ds(0, lx)] = xv
    zrow = jnp.zeros((1, la), jnp.float32)
    u_ref[pl.ds(0, 1), pl.ds(lx, la)] = zrow
    u_ref[pl.ds(h_img - 1, 1), pl.ds(lx, la)] = zrow
    u_ref[pl.ds(1, ho_rows), pl.ds(lx, la)] = a1

    # -- stage 2: relu(conv1(a_pad)*s1 + conv2(x)*s2 + t1 + t2), ONE dot -----
    lhs2 = jnp.concatenate([u_ref[pl.ds(k, ho_rows), :] for k in range(kh_taps)],
                           axis=1)                                   # (Ho, KH*(LX+LA))
    out = jnp.maximum(
        jnp.dot(lhs2, w2_ref[...], preferred_element_type=jnp.float32)
        + b2_ref[...], 0.0)
    o_ref[0] = out.astype(o_ref.dtype)


# ----------------------------- weight folding ------------------------------- #

def _fold_bn(gamma, beta, mean, var, eps=1e-3):
    inv = gamma / jnp.sqrt(var + eps)
    return inv, beta - mean * inv


def _block_toeplitz(w_hwio, w_img, kw_shift, w_valid, lane_width):
    """Banded weight slab for a row-flattened (lane = w*C + c) image slab.

    w_hwio: (KH, KW, Cs, Co) bn-scaled weights.  Returns (KH, lane_width, w_img*Co)
    with out[kh, w*Cs + c, wo*Co + co] = w_hwio[kh, w - wo + kw_shift, c, co]
    when that tap index is in [0, KW) and w < w_valid, else 0.  Rows beyond
    w_img*Cs are zero lane padding.
    """
    KH, KW, Cs, Co = w_hwio.shape
    w = jnp.arange(w_img)
    kw = w[:, None] - w[None, :] + kw_shift                          # (w, wo)
    ok = (kw >= 0) & (kw < KW) & (w[:, None] < w_valid)
    t = w_hwio[:, jnp.clip(kw, 0, KW - 1)]                           # (KH, w, wo, Cs, Co)
    t = t * ok[None, :, :, None, None]
    t = jnp.transpose(t, (0, 1, 3, 2, 4)).reshape(KH, w_img * Cs, w_img * Co)
    if lane_width > w_img * Cs:
        t = jnp.pad(t, ((0, 0), (0, lane_width - w_img * Cs), (0, 0)))
    return t


# ----------------------------- module forward ------------------------------- #

def cascaded_conv2d_bn_sum_relu(x_nchw, p):
    """Matches CascadedConv2dBnSumRelu.forward (eval-mode BN). x_nchw: (N,Cin,H,W)."""
    N, Cin, H, W = x_nchw.shape
    Cmid, _, KH, KW = p["conv_w"].shape
    Cout = p["conv1_w"].shape[0]
    Ho, Wo = H - KH + 1, W - KW + 1
    PAD = 1                          # conv1 padding (module spec: padding=1, stride=1)
    assert Ho + 2 * PAD == H and Wo + 2 * PAD == W, "fused layout assumes k=3, pad=1, stride=1"

    LX = -(-(W * Cin) // 128) * 128  # x-slab lane width (vreg aligned)
    LA = W * Cmid                    # a-slab lane width
    LO = W * Cout                    # output lane width (lane-dense store)

    s0, t0 = _fold_bn(*p["bn"])
    s1, t1 = _fold_bn(*p["bn1"])
    s2, t2 = _fold_bn(*p["bn2"])

    # OIHW -> HWIO with the bn scale folded into output channels.
    w0s = jnp.transpose(p["conv_w"],  (2, 3, 1, 0)) * s0             # (KH,KW,Cin, Cmid)
    w1s = jnp.transpose(p["conv1_w"], (2, 3, 1, 0)) * s1             # (KH,KW,Cmid,Cout)
    w2s = jnp.transpose(p["conv2_w"], (2, 3, 1, 0)) * s2             # (KH,KW,Cin, Cout)

    # Stage-1 RHS (x slab only): (KH*LX, W*Cmid)
    rhs1 = _block_toeplitz(w0s, W, 0, W, LX).reshape(KH * LX, LA)
    # Stage-2 RHS over [x || a] slabs: (KH*(LX+LA), W*Cout)
    #   x slab : conv2 (valid conv on x)
    #   a slab : conv1 with its pad=1 column shift folded in (kw_shift=1) and
    #            the wrap columns of `a` (w >= Wo) zero-weighted.
    rx = _block_toeplitz(w2s, W, 0, W, LX)
    ra = _block_toeplitz(w1s, W, 1, Wo, LA)
    rhs2 = jnp.concatenate([rx, ra], axis=1).reshape(KH * (LX + LA), LO)

    b1 = jnp.tile(t0, W).reshape(1, LA).astype(jnp.float32)
    b2 = jnp.tile(t1 + t2, W).reshape(1, LO).astype(jnp.float32)

    # Input: NCHW -> (N, H, W*Cin) rows, lane-padded to LX (no dead-channel interleave).
    xl = jnp.transpose(x_nchw, (0, 2, 3, 1)).reshape(N, H, W * Cin).astype(jnp.float32)
    if LX > W * Cin:
        xl = jnp.pad(xl, ((0, 0), (0, 0), (0, LX - W * Cin)))

    kern = functools.partial(_fused_kernel, kh_taps=KH, ho_rows=Ho)

    out = pl.pallas_call(
        kern,
        out_shape=jax.ShapeDtypeStruct((N, Ho, LO), jnp.float32),
        grid_spec=pltpu.PrefetchScalarGridSpec(
            num_scalar_prefetch=0,
            grid=(N,),
            in_specs=[
                pl.BlockSpec((1, H, LX), lambda n: (n, 0, 0)),
                pl.BlockSpec((KH * LX, LA), lambda n: (0, 0)),
                pl.BlockSpec((1, LA), lambda n: (0, 0)),
                pl.BlockSpec((KH * (LX + LA), LO), lambda n: (0, 0)),
                pl.BlockSpec((1, LO), lambda n: (0, 0)),
            ],
            out_specs=pl.BlockSpec((1, Ho, LO), lambda n: (n, 0, 0)),
            scratch_shapes=[pltpu.VMEM((H, LX + LA), jnp.float32)],
        ),
        compiler_params=pltpu.CompilerParams(dimension_semantics=("parallel",)),
    )(xl, rhs1, b1, rhs2, b2)

    y = out.reshape(N, Ho, W, Cout)[:, :, :Wo, :]                    # drop wrap columns
    return jnp.transpose(y, (0, 3, 1, 2))                            # NHWC -> NCHW


# ----------------------------- params & reference --------------------------- #

def init_params(key, cin, cmid, cout, k=3):
    ks = jax.random.split(key, 15)

    def conv_w(kk, co, ci):
        bound = 1.0 / float(ci * k * k) ** 0.5
        return jax.random.uniform(kk, (co, ci, k, k), jnp.float32, -bound, bound)

    def bn_p(k1, k2, k3, k4, c):
        gamma = jax.random.uniform(k1, (c,), jnp.float32, 0.5, 1.5)
        beta = jax.random.uniform(k2, (c,), jnp.float32, -0.5, 0.5)
        mean = 0.1 * jax.random.normal(k3, (c,), jnp.float32)
        var = jax.random.uniform(k4, (c,), jnp.float32, 0.5, 1.5)
        return (gamma, beta, mean, var)

    return {
        "conv_w": conv_w(ks[0], cmid, cin),
        "conv1_w": conv_w(ks[1], cout, cmid),
        "conv2_w": conv_w(ks[2], cout, cin),
        "bn": bn_p(ks[3], ks[4], ks[5], ks[6], cmid),
        "bn1": bn_p(ks[7], ks[8], ks[9], ks[10], cout),
        "bn2": bn_p(ks[11], ks[12], ks[13], ks[14], cout),
    }


def _reference(x, p):
    dn = ("NCHW", "OIHW", "NCHW")

    def conv(z, w, pad):
        return jax.lax.conv_general_dilated(
            z, w, window_strides=(1, 1), padding=[(pad, pad), (pad, pad)],
            dimension_numbers=dn, precision=jax.lax.Precision.HIGHEST)

    def bn(z, stats):
        g, b, m, v = stats
        inv = g / jnp.sqrt(v + 1e-3)
        return z * inv[None, :, None, None] + (b - m * inv)[None, :, None, None]

    a = jax.nn.relu(bn(conv(x, p["conv_w"], 0), p["bn"]))
    a = bn(conv(a, p["conv1_w"], 1), p["bn1"])
    b = bn(conv(x, p["conv2_w"], 0), p["bn2"])
    return jax.nn.relu(a + b)


# ----------------------------- main ------------------------------------------ #

if __name__ == "__main__":
    N, Cin, Cmid, Cout, H, W = 2, 4, 8, 8, 16, 16
    key = jax.random.PRNGKey(0)
    kx, kp = jax.random.split(key)
    params = init_params(kp, Cin, Cmid, Cout)
    x = jax.random.normal(kx, (N, Cin, H, W), jnp.float32)

    fwd = jax.jit(cascaded_conv2d_bn_sum_relu)
    out = jax.block_until_ready(fwd(x, params))
    assert out.shape == (N, Cout, H - 2, W - 2), out.shape

    ref = _reference(x, params)
    if not bool(jnp.allclose(out, ref, rtol=1e-3, atol=1e-3)):
        raise AssertionError(
            f"mismatch vs reference, max abs err = {float(jnp.max(jnp.abs(out - ref)))}")
    print("KERNEL_OK")
</pallas_src>

<mosaic_0001>
module attributes {stable_mosaic.version = 11 : i64} {
  func.func @_fused_kernel(%arg0: i32, %arg1: memref<1x16x128xf32, #tpu.memory_space<vmem>>, %arg2: memref<384x128xf32, #tpu.memory_space<vmem>>, %arg3: memref<1x128xf32, #tpu.memory_space<vmem>>, %arg4: memref<768x128xf32, #tpu.memory_space<vmem>>, %arg5: memref<1x128xf32, #tpu.memory_space<vmem>>, %arg6: memref<1x14x128xf32, #tpu.memory_space<vmem>>, %arg7: memref<16x256xf32, #tpu.memory_space<vmem>>) attributes {dimension_semantics = [#tpu.dimension_semantics<parallel>], iteration_bounds = array<i64: 2>, scalar_prefetch = 0 : i64, scratch_operands = 1 : i64, tpu.core_type = #tpu.core_type<tc>, window_params = [{transform_indices = @transform_0, window_bounds = array<i64: 1, 16, 128>}, {pipeline_mode = #tpu.pipeline_mode<synchronous>, transform_indices = @transform_1, window_bounds = array<i64: 384, 128>}, {pipeline_mode = #tpu.pipeline_mode<synchronous>, transform_indices = @transform_2, window_bounds = array<i64: 1, 128>}, {pipeline_mode = #tpu.pipeline_mode<synchronous>, transform_indices = @transform_3, window_bounds = array<i64: 768, 128>}, {pipeline_mode = #tpu.pipeline_mode<synchronous>, transform_indices = @transform_4, window_bounds = array<i64: 1, 128>}, {transform_indices = @transform_5, window_bounds = array<i64: 1, 14, 128>}]} {
    %c0 = arith.constant 0 : index
    %c0_0 = arith.constant 0 : index
    %c0_1 = arith.constant 0 : index
    %0 = vector.load %arg1[%c0, %c0_0, %c0_1] : memref<1x16x128xf32, #tpu.memory_space<vmem>>, vector<1x16x128xf32>
    %1 = vector.shape_cast %0 : vector<1x16x128xf32> to vector<16x128xf32>
    %2 = vector.extract_strided_slice %1 {offsets = [0, 0], sizes = [14, 128], strides = [1, 1]} : vector<16x128xf32> to vector<14x128xf32>
    %3 = vector.extract_strided_slice %1 {offsets = [1, 0], sizes = [14, 128], strides = [1, 1]} : vector<16x128xf32> to vector<14x128xf32>
    %4 = vector.extract_strided_slice %1 {offsets = [2, 0], sizes = [14, 128], strides = [1, 1]} : vector<16x128xf32> to vector<14x128xf32>
    %5 = tpu.concatenate %2, %3, %4 in 1 : vector<14x128xf32>, vector<14x128xf32>, vector<14x128xf32> -> vector<14x384xf32>
    %c0_2 = arith.constant 0 : index
    %c0_3 = arith.constant 0 : index
    %6 = vector.load %arg2[%c0_2, %c0_3] : memref<384x128xf32, #tpu.memory_space<vmem>>, vector<384x128xf32>
    %cst = arith.constant dense<0.000000e+00> : vector<14x128xf32>
    %7 = tpu.matmul %5, %6, %cst {dimension_numbers = #tpu.dot_dimension_numbers<[1], [0], [0], [1], [0, 0, 1, 1], [], []>} : vector<14x384xf32>, vector<384x128xf32>, vector<14x128xf32> -> vector<14x128xf32>
    %c0_4 = arith.constant 0 : index
    %c0_5 = arith.constant 0 : index
    %8 = vector.load %arg3[%c0_4, %c0_5] : memref<1x128xf32, #tpu.memory_space<vmem>>, vector<1x128xf32>
    %9 = vector.broadcast %8 : vector<1x128xf32> to vector<14x128xf32>
    %10 = arith.addf %7, %9 : vector<14x128xf32>
    %cst_6 = arith.constant 0.000000e+00 : f32
    %11 = vector.broadcast %cst_6 : f32 to vector<14x128xf32>
    %12 = arith.maximumf %10, %11 : vector<14x128xf32>
    %c0_7 = arith.constant 0 : index
    %c0_8 = arith.constant 0 : index
    %13 = vector.load %arg7[%c0_7, %c0_8] : memref<16x256xf32, #tpu.memory_space<vmem>>, vector<16x128xf32>
    tpu.vector_store %arg7[%c0_7, %c0_8], %1 {strides = array<i32>} : memref<16x256xf32, #tpu.memory_space<vmem>>, vector<16x128xf32>,
    %cst_9 = arith.constant 0.000000e+00 : f32
    %14 = vector.broadcast %cst_9 : f32 to vector<1x128xf32>
    %c0_10 = arith.constant 0 : index
    %c128 = arith.constant 128 : index
    %15 = vector.load %arg7[%c0_10, %c128] : memref<16x256xf32, #tpu.memory_space<vmem>>, vector<1x128xf32>
    tpu.vector_store %arg7[%c0_10, %c128], %14 {strides = array<i32>} : memref<16x256xf32, #tpu.memory_space<vmem>>, vector<1x128xf32>,
    %c15 = arith.constant 15 : index
    %c128_11 = arith.constant 128 : index
    %16 = vector.load %arg7[%c15, %c128_11] : memref<16x256xf32, #tpu.memory_space<vmem>>, vector<1x128xf32>
    tpu.vector_store %arg7[%c15, %c128_11], %14 {strides = array<i32>} : memref<16x256xf32, #tpu.memory_space<vmem>>, vector<1x128xf32>,
    %c1 = arith.constant 1 : index
    %c128_12 = arith.constant 128 : index
    %17 = vector.load %arg7[%c1, %c128_12] : memref<16x256xf32, #tpu.memory_space<vmem>>, vector<14x128xf32>
    tpu.vector_store %arg7[%c1, %c128_12], %12 {strides = array<i32>} : memref<16x256xf32, #tpu.memory_space<vmem>>, vector<14x128xf32>,
    %c0_13 = arith.constant 0 : index
    %c0_14 = arith.constant 0 : index
    %18 = vector.load %arg7[%c0_13, %c0_14] : memref<16x256xf32, #tpu.memory_space<vmem>>, vector<14x256xf32>
    %c1_15 = arith.constant 1 : index
    %c0_16 = arith.constant 0 : index
    %19 = vector.load %arg7[%c1_15, %c0_16] : memref<16x256xf32, #tpu.memory_space<vmem>>, vector<14x256xf32>
    %c2 = arith.constant 2 : index
    %c0_17 = arith.constant 0 : index
    %20 = vector.load %arg7[%c2, %c0_17] : memref<16x256xf32, #tpu.memory_space<vmem>>, vector<14x256xf32>
    %21 = tpu.concatenate %18, %19, %20 in 1 : vector<14x256xf32>, vector<14x256xf32>, vector<14x256xf32> -> vector<14x768xf32>
    %c0_18 = arith.constant 0 : index
    %c0_19 = arith.constant 0 : index
    %22 = vector.load %arg4[%c0_18, %c0_19] : memref<768x128xf32, #tpu.memory_space<vmem>>, vector<768x128xf32>
    %cst_20 = arith.constant dense<0.000000e+00> : vector<14x128xf32>
    %23 = tpu.matmul %21, %22, %cst_20 {dimension_numbers = #tpu.dot_dimension_numbers<[1], [0], [0], [1], [0, 0, 1, 1], [], []>} : vector<14x768xf32>, vector<768x128xf32>, vector<14x128xf32> -> vector<14x128xf32>
    %c0_21 = arith.constant 0 : index
    %c0_22 = arith.constant 0 : index
    %24 = vector.load %arg5[%c0_21, %c0_22] : memref<1x128xf32, #tpu.memory_space<vmem>>, vector<1x128xf32>
    %25 = vector.broadcast %24 : vector<1x128xf32> to vector<14x128xf32>
    %26 = arith.addf %23, %25 : vector<14x128xf32>
    %cst_23 = arith.constant 0.000000e+00 : f32
    %27 = vector.broadcast %cst_23 : f32 to vector<14x128xf32>
    %28 = arith.maximumf %26, %27 : vector<14x128xf32>
    %c0_24 = arith.constant 0 : index
    %c0_25 = arith.constant 0 : index
    %c0_26 = arith.constant 0 : index
    %29 = vector.load %arg6[%c0_24, %c0_25, %c0_26] : memref<1x14x128xf32, #tpu.memory_space<vmem>>, vector<1x14x128xf32>
    %30 = vector.shape_cast %29 : vector<1x14x128xf32> to vector<14x128xf32>
    %31 = vector.shape_cast %28 : vector<14x128xf32> to vector<1x14x128xf32>
    tpu.vector_store %arg6[%c0_24, %c0_25, %c0_26], %31 {strides = array<i32>} : memref<1x14x128xf32, #tpu.memory_space<vmem>>, vector<1x14x128xf32>,
    return
  }
  func.func @transform_0(%arg0: i32) -> (i32, i32, i32) {
    %c0_i32 = arith.constant 0 : i32
    %c0_i32_0 = arith.constant 0 : i32
    %c0_i32_1 = arith.constant 0 : i32
    return %arg0, %c0_i32, %c0_i32_0 : i32, i32, i32
  }
  func.func @transform_1(%arg0: i32) -> (i32, i32) {
    %c0_i32 = arith.constant 0 : i32
    %c0_i32_0 = arith.constant 0 : i32
    %c0_i32_1 = arith.constant 0 : i32
    return %c0_i32, %c0_i32_0 : i32, i32
  }
  func.func @transform_2(%arg0: i32) -> (i32, i32) {
    %c0_i32 = arith.constant 0 : i32
    %c0_i32_0 = arith.constant 0 : i32
    %c0_i32_1 = arith.constant 0 : i32
    return %c0_i32, %c0_i32_0 : i32, i32
  }
  func.func @transform_3(%arg0: i32) -> (i32, i32) {
    %c0_i32 = arith.constant 0 : i32
    %c0_i32_0 = arith.constant 0 : i32
    %c0_i32_1 = arith.constant 0 : i32
    return %c0_i32, %c0_i32_0 : i32, i32
  }
  func.func @transform_4(%arg0: i32) -> (i32, i32) {
    %c0_i32 = arith.constant 0 : i32
    %c0_i32_0 = arith.constant 0 : i32
    %c0_i32_1 = arith.constant 0 : i32
    return %c0_i32, %c0_i32_0 : i32, i32
  }
  func.func @transform_5(%arg0: i32) -> (i32, i32, i32) {
    %c0_i32 = arith.constant 0 : i32
    %c0_i32_0 = arith.constant 0 : i32
    %c0_i32_1 = arith.constant 0 : i32
    return %arg0, %c0_i32, %c0_i32_0 : i32, i32, i32
  }
}

</mosaic_0001>

<bundles_post_ra>
// kernel: tile.13
= control target key start
LH: loop header
LB: loop body
LE: loop exit
PB: predicated region body
PF: predicated region fallthrough
CT: control target
= control target key end

     0   :  { %s28_s0 = inlined_call_operand.vmem [shape: f32[8], index: 0, kind: input, shape index: {}]   ;;  %s29_s1 = inlined_call_operand.vmem [shape: f32[16,8], index: 1, kind: output, shape index: {}]  }
   0x1   :  { %v4_v0 = vld [vmem:[%s28_s0] ss:$0 sm:$0xff] }
   0x2   :  { %5 = vst [vmem:[%s29_s1] sm:$0xff] %v4_v0  ;;  %8 = vst [vmem:[%s29_s1 + $0x8] sm:$0xff] %v4_v0 }

// kernel: tile.14
= control target key start
LH: loop header
LB: loop body
LE: loop exit
PB: predicated region body
PF: predicated region fallthrough
CT: control target
= control target key end

     0   :  { %s131_s10 = smov 120   ;;  %s132_s11 = smov 104   ;;  %vm3_vm0 = vcmask 64512   ;;  %vm9_vm1 = vcmask 1048512   ;;  %vm15_vm2 = vcmask 982912   ;;  %vm21_vm3 = vcmask 917312   ;;  %s207_s0 = inlined_call_operand.vmem [shape: f32[16,8], index: 0, kind: input, shape index: {}]   ;;  %s208_s1 = inlined_call_operand.vmem [shape: f32[1,128], index: 1, kind: output, shape index: {}]  }
   0x1   :  { %v101_v0 = vld [vmem:[%s207_s0 + $0xf] sm:$0x1]   ;;  %v103_v1 = vld [vmem:[%s207_s0 + $0xd] sm:$0x1]   ;;  %v102_v2 = vld [vmem:[%s207_s0 + $0xe] sm:$0x1]  }
   0x2   :  { %7 = vrot.lane.b32.xlu0 %v101_v0, %s131_s10  ;;  %19 = vrot.lane.b32.xlu1 %v103_v1, %s132_s11  ;;  %v104_v3 = vld [vmem:[%s207_s0 + $0xc] sm:$0x1]   ;;  %s133_s16 = smov 112   ;;  %s134_s17 = smov 96   ;;  %v105_v4 = vld [vmem:[%s207_s0 + $0xb] sm:$0x1]  }
   0x3   :  { %v106_v5 = vld [vmem:[%s207_s0 + $0xa] sm:$0x1]   ;;  %v2_v6 = vld [vmem:[%s207_s0] sm:$0x1]   ;;  %s135_s24 = smov 88   ;;  %s136_s25 = smov 80  }
   0x4   :  { %4 = vst.msk [vmem:[#allocation0] sm:$0x1] %vm3_vm0, %v2_v6   ;;  %v107_v7 = vld [vmem:[%s207_s0 + $0x9] sm:$0x1]   ;;  %v108_v8 = vld [vmem:[%s207_s0 + $0x8] sm:$0x1]  }
   0x5   :  { %s137_s30 = smov 72   ;;  %s138_s2 = smov 64   ;;  %v109_v9 = vld [vmem:[%s207_s0 + $0x7] sm:$0x1]   ;;  %v110_v10 = vld [vmem:[%s207_s0 + $0x6] sm:$0x1]  }
   0x6   :  { %13 = vrot.lane.b32.xlu0 %v102_v2, %s133_s16  ;;  %25 = vrot.lane.b32.xlu1 %v104_v3, %s134_s17  ;;  %s139_s7 = smov 56   ;;  %s140_s8 = smov 48   ;;  %v111_v11 = vld [vmem:[%s207_s0 + $0x5] sm:$0x1]   ;;  %v112_v12 = vld [vmem:[%s207_s0 + $0x4] sm:$0x1]  }
   0x7   :  { %s141_s13 = smov 40   ;;  %s142_s14 = smov 32   ;;  %v113_v13 = vld [vmem:[%s207_s0 + $0x3] sm:$0x1]   ;;  %v114_v14 = vld [vmem:[%s207_s0 + $0x2] sm:$0x1]  }
   0x8   :  { %s143_s19 = smov 24   ;;  %s144_s20 = smov 16   ;;  %v115_v15 = vld [vmem:[%s207_s0 + $0x1] sm:$0x1]   ;;  %vm27_vm4 = vcmask 851712   ;;  %vm33_vm5 = vcmask 786112  }
   0x9   :  { %s145_s0 = smov 8   ;;  %vm39_vm6 = vcmask 720512   ;;  %vm45_vm7 = vcmask 654912   ;;  %vm51_vm8 = vcmask 589312   ;;  %vm57_vm9 = vcmask 523712  }
   0xa   :  { %31 = vrot.lane.b32.xlu0 %v105_v4, %s135_s24  ;;  %37 = vrot.lane.b32.xlu1 %v106_v5, %s136_s25  ;;  %vm63_vm10 = vcmask 458112   ;;  %vm69_vm11 = vcmask 392512   ;;  %vm75_vm12 = vcmask 326912   ;;  %vm81_vm13 = vcmask 261312  }
   0xb   :  { %vm87_vm14 = vcmask 195712   ;;  %vm93_vm15 = vcmask 130112  }
   0xe   :  { %43 = vrot.lane.b32.xlu0 %v107_v7, %s137_s30  ;;  %49 = vrot.lane.b32.xlu1 %v108_v8, %s138_s2 }
  0x12   :  { %55 = vrot.lane.b32.xlu0 %v109_v9, %s139_s7  ;;  %61 = vrot.lane.b32.xlu1 %v110_v10, %s140_s8 }
  0x16   :  { %67 = vrot.lane.b32.xlu0 %v111_v11, %s141_s13  ;;  %73 = vrot.lane.b32.xlu1 %v112_v12, %s142_s14 }
  0x1a   :  { %79 = vrot.lane.b32.xlu0 %v113_v13, %s143_s19  ;;  %85 = vrot.lane.b32.xlu1 %v114_v14, %s144_s20 }
  0x1e   :  { %91 = vrot.lane.b32.xlu0 %v115_v15, %s145_s0 }
  0x74   :  { %v8_v16 = vpop.permute.xlu0 %7   ;;  %v20_v17 = vpop.permute.xlu1 %19  }
  0x75   :  { %10 = vst.msk [vmem:[#allocation0] sm:$0x1] %vm9_vm1, %v8_v16  }
  0x78   :  { %v14_v18 = vpop.permute.xlu0 %13   ;;  %v26_v19 = vpop.permute.xlu1 %25  }
  0x79   :  { %16 = vst.msk [vmem:[#allocation0] sm:$0x1] %vm15_vm2, %v14_v18  }
  0x7a   :  { %22 = vst.msk [vmem:[#allocation0] sm:$0x1] %vm21_vm3, %v20_v17  }
  0x7b   :  { %28 = vst.msk [vmem:[#allocation0] sm:$0x1] %vm27_vm4, %v26_v19  }
  0x7c   :  { %v32_v20 = vpop.permute.xlu0 %31   ;;  %v38_v21 = vpop.permute.xlu1 %37  }
  0x7d   :  { %34 = vst.msk [vmem:[#allocation0] sm:$0x1] %vm33_vm5, %v32_v20  }
  0x7e   :  { %40 = vst.msk [vmem:[#allocation0] sm:$0x1] %vm39_vm6, %v38_v21  }
  0x80   :  { %v44_v22 = vpop.permute.xlu0 %43   ;;  %v50_v23 = vpop.permute.xlu1 %49  }
  0x81   :  { %46 = vst.msk [vmem:[#allocation0] sm:$0x1] %vm45_vm7, %v44_v22  }
  0x82   :  { %52 = vst.msk [vmem:[#allocation0] sm:$0x1] %vm51_vm8, %v50_v23  }
  0x84   :  { %v56_v24 = vpop.permute.xlu0 %55   ;;  %v62_v25 = vpop.permute.xlu1 %61  }
  0x85   :  { %58 = vst.msk [vmem:[#allocation0] sm:$0x1] %vm57_vm9, %v56_v24  }
  0x86   :  { %64 = vst.msk [vmem:[#allocation0] sm:$0x1] %vm63_vm10, %v62_v25  }
  0x88   :  { %v68_v26 = vpop.permute.xlu0 %67   ;;  %v74_v27 = vpop.permute.xlu1 %73  }
  0x89   :  { %70 = vst.msk [vmem:[#allocation0] sm:$0x1] %vm69_vm11, %v68_v26  }
  0x8a   :  { %76 = vst.msk [vmem:[#allocation0] sm:$0x1] %vm75_vm12, %v74_v27  }
  0x8c   :  { %v80_v28 = vpop.permute.xlu0 %79   ;;  %v86_v29 = vpop.permute.xlu1 %85  }
  0x8d   :  { %82 = vst.msk [vmem:[#allocation0] sm:$0x1] %vm81_vm13, %v80_v28  }
  0x8e   :  { %88 = vst.msk [vmem:[#allocation0] sm:$0x1] %vm87_vm14, %v86_v29  }
  0x90   :  { %v92_v30 = vpop.permute.xlu0 %91  }
  0x91   :  { %94 = vst.msk [vmem:[#allocation0] sm:$0x1] %vm93_vm15, %v92_v30  }
  0x98   :  { %v98_v31 = vld [vmem:[#allocation0] sm:$0x1] }
  0x99   :  { %100 = vst [vmem:[%s208_s1] sm:$0x1] %v98_v31 }

// kernel: cascaded_conv2d_bn_sum_relu.1
= control target key start
LH: loop header
LB: loop body
LE: loop exit
PB: predicated region body
PF: predicated region fallthrough
CT: control target
= control target key end

     0   :  { %s1333_s18 = smov 0   ;;  %s1834_s0 = inlined_call_operand.vmem [shape: f32[2,16,128], index: 0, kind: input, shape index: {}]   ;;  %s1835_s1 = inlined_call_operand.vmem [shape: f32[384,128], index: 1, kind: input, shape index: {}]   ;;  %s1836_s2 = inlined_call_operand.vmem [shape: f32[1,128], index: 2, kind: input, shape index: {}]   ;;  %s1837_s3 = inlined_call_operand.vmem [shape: f32[768,128], index: 3, kind: input, shape index: {}]   ;;  %s1838_s4 = inlined_call_operand.vmem [shape: f32[1,128], index: 4, kind: input, shape index: {}]   ;;  %s1839_s5 = inlined_call_operand.vmem [shape: f32[2,14,128], index: 5, kind: output, shape index: {}]  }
   0x1 LB: > { %s889_s19 = sadd.s32 4294967295, %s1300_s18   ;;  %p893_p0 = scmp.ge.s32.totalorder %s1300_s18, 1  ;;  %s1300_s18 = sphi %s1333_s18, %s15_s18  }
   0x2   : > { %p187_p1 = scmp.lt.s32.totalorder %s1300_s18, 3 }
   0x4   : > { %p188_p2 = pnand %p893_p0, %p187_p1 }
   0x5   : > { %v257_v0 = vld [vmem:[%s1835_s1 + $0x80] sm:$0xff] (!%p188_p2)  ;;  %v258_v1 = vld [vmem:[%s1835_s1 + $0x88] sm:$0xff] (!%p188_p2)  ;;  %v259_v5 = vld [vmem:[%s1835_s1 + $0x90] sm:$0xff] (!%p188_p2)  ;;  %p1361_p3 = scmp.lt.s32.totalorder (!%p188_p2), %s889_s19, 1  ;;  %vm229_vm0 = vcmask (!%p188_p2), 1046528   ;;  %vm235_vm1 = vcmask (!%p188_p2), 1045504  }
   0x6   : > { %191 = sbr.rel (%p188_p2) target bundleno = 533 (0x215), region = 40  ;;  %v241_v2 = vld [vmem:[%s1835_s1] sm:$0xff] (!%p188_p2)  ;;  %v1109_v3 = vpack.c.bf16 (!%p188_p2), %v258_v1, %v257_v0  ;;  %v242_v4 = vld [vmem:[%s1835_s1 + $0x8] sm:$0xff] (!%p188_p2)  ;;  %v260_v6 = vld [vmem:[%s1835_s1 + $0x98] sm:$0xff] (!%p188_p2)  ;;  %vm454_vm2 = vcmask (!%p188_p2), 1040384  }
   0x7   : > { %v1111_v7 = vpack.c.bf16 (!%p188_p2), %v242_v4, %v241_v2  ;;  %v1113_v8 = vpack.c.bf16 (!%p188_p2), %v260_v6, %v259_v5  ;;  %v273_v9 = vld [vmem:[%s1835_s1 + $0x100] sm:$0xff] (!%p188_p2)  ;;  %v274_v10 = vld [vmem:[%s1835_s1 + $0x108] sm:$0xff] (!%p188_p2)  ;;  %v243_v11 = vld [vmem:[%s1835_s1 + $0x10] sm:$0xff] (!%p188_p2) }
   0x8   : > { %1110 = vmatprep.subr.bf16.mxu0 (!%p188_p2), %v1109_v3  ;;  %v1141_v12 = vpack.c.bf16 (!%p188_p2), %v274_v10, %v273_v9  ;;  %v244_v13 = vld [vmem:[%s1835_s1 + $0x18] sm:$0xff] (!%p188_p2)  ;;  %v261_v14 = vld [vmem:[%s1835_s1 + $0xa0] sm:$0xff] (!%p188_p2)  ;;  %v262_v15 = vld [vmem:[%s1835_s1 + $0xa8] sm:$0xff] (!%p188_p2) }
   0x9   : > { %1112 = vmatpush3.bf16.msra.mxu0 (!%p188_p2), %v1111_v7  ;;  %v1115_v16 = vpack.c.bf16 (!%p188_p2), %v244_v13, %v243_v11  ;;  %v275_v17 = vld [vmem:[%s1835_s1 + $0x110] sm:$0xff] (!%p188_p2)  ;;  %v276_v18 = vld [vmem:[%s1835_s1 + $0x118] sm:$0xff] (!%p188_p2)  ;;  %v1117_v19 = vpack.c.bf16 (!%p188_p2), %v262_v15, %v261_v14  ;;  %v245_v21 = vld [vmem:[%s1835_s1 + $0x20] sm:$0xff] (!%p188_p2) }
   0xa   : > { %1114 = vmatprep.subr.bf16.mxu0 (!%p188_p2), %v1113_v8  ;;  %1142 = vmatprep.subr.bf16.mxu1 (!%p188_p2), %v1141_v12  ;;  %v1145_v20 = vpack.c.bf16 (!%p188_p2), %v276_v18, %v275_v17  ;;  %v246_v22 = vld [vmem:[%s1835_s1 + $0x28] sm:$0xff] (!%p188_p2)  ;;  %v263_v23 = vld [vmem:[%s1835_s1 + $0xb0] sm:$0xff] (!%p188_p2)  ;;  %v264_v24 = vld [vmem:[%s1835_s1 + $0xb8] sm:$0xff] (!%p188_p2) }
   0xb   : > { %1144 = vmatpush3.bf16.msra.mxu1 (!%p188_p2), %v1141_v12  ;;  %v277_v25 = vld [vmem:[%s1835_s1 + $0x120] sm:$0xff] (!%p188_p2)  ;;  %v278_v26 = vld [vmem:[%s1835_s1 + $0x128] sm:$0xff] (!%p188_p2)  ;;  %v1119_v28 = vpack.c.bf16 (!%p188_p2), %v246_v22, %v245_v21  ;;  %v279_v29 = vld [vmem:[%s1835_s1 + $0x130] sm:$0xff] (!%p188_p2)  ;;  %v1121_v31 = vpack.c.bf16 (!%p188_p2), %v264_v24, %v263_v23 }
   0xc   : > { %1146 = vmatprep.subr.bf16.mxu1 (!%p188_p2), %v1145_v20  ;;  %v1149_v27 = vpack.c.bf16 (!%p188_p2), %v278_v26, %v277_v25  ;;  %v280_v30 = vld [vmem:[%s1835_s1 + $0x138] sm:$0xff] (!%p188_p2)  ;;  %v247_v32 = vld [vmem:[%s1835_s1 + $0x30] sm:$0xff] (!%p188_p2)  ;;  %v265_v34 = vld [vmem:[%s1835_s1 + $0xc0] sm:$0xff] (!%p188_p2) }
   0xd   : > { %s1842_s19 = smov (!%p1361_p3, %s889_s19), 1  ;;  %1116 = vmatpush3.bf16.msra.mxu0 %v1115_v16  ;;  %v248_v33 = vld [vmem:[%s1835_s1 + $0x38] sm:$0xff]  ;;  %v266_v35 = vld [vmem:[%s1835_s1 + $0xc8] sm:$0xff]  ;;  %v1153_v36 = vpack.c.bf16 %v280_v30, %v279_v29  ;;  %v281_v38 = vld [vmem:[%s1835_s1 + $0x140] sm:$0xff] }
   0xe   : > { %1118 = vmatprep.subr.bf16.mxu0 %v1117_v19  ;;  %s902_s23 = sshll.u32 %s1842_s19, 4  ;;  %v1123_v37 = vpack.c.bf16 %v248_v33, %v247_v32  ;;  %v282_v39 = vld [vmem:[%s1835_s1 + $0x148] sm:$0xff]  ;;  %v1125_v40 = vpack.c.bf16 %v266_v35, %v265_v34  ;;  %v249_v41 = vld [vmem:[%s1835_s1 + $0x40] sm:$0xff]  ;;  %v267_v43 = vld [vmem:[%s1835_s1 + $0xd0] sm:$0xff] }
   0xf   : > { %1148 = vmatpush3.bf16.msra.mxu1 %v1145_v20  ;;  %s219_s10 = scalar_lea.vmem %s1834_s0, %s902_s23  ;;  %v250_v42 = vld [vmem:[%s1835_s1 + $0x48] sm:$0xff]  ;;  %v268_v44 = vld [vmem:[%s1835_s1 + $0xd8] sm:$0xff]  ;;  %v1157_v45 = vpack.c.bf16 %v282_v39, %v281_v38  ;;  %v283_v49 = vld [vmem:[%s1835_s1 + $0x150] sm:$0xff]  ;;  %s224_s6 = scalar_lea.vmem %s1839_s5, %s902_s23 }
  0x10   : > { %1150 = vmatprep.subr.bf16.mxu1 %v1149_v27  ;;  %v1455_v46 = vld [vmem:[%s219_s10] sm:$0xff]  ;;  %v1457_v47 = vld [vmem:[%s219_s10 + $0x8] sm:$0xff]  ;;  %v1127_v48 = vpack.c.bf16 %v250_v42, %v249_v41  ;;  %v284_v50 = vld [vmem:[%s1835_s1 + $0x158] sm:$0xff]  ;;  %v1129_v54 = vpack.c.bf16 %v268_v44, %v267_v43 }
  0x11   : > { %1120 = vmatpush3.bf16.msra.mxu0 %v1119_v28  ;;  %v230_v51 = vrot.slane %v1455_v46, 1  ;;  %v231_v52 = vrot.slane %v1457_v47, 1  ;;  %448 = vst [vmem:[#allocation2] sm:$0xff] %v1455_v46  ;;  %449 = vst [vmem:[#allocation2 + $0x10] sm:$0xff] %v1457_v47  ;;  %v236_v53 = vrot.slane %v1455_v46, 2  ;;  %v251_v55 = vld [vmem:[%s1835_s1 + $0x50] sm:$0xff]  ;;  %v1161_v61 = vpack.c.bf16 %v284_v50, %v283_v49 }
  0x12   : > { %1122 = vmatprep.subr.bf16.mxu0 %v1121_v31  ;;  %v252_v56 = vld [vmem:[%s1835_s1 + $0x58] sm:$0xff]  ;;  %v1477_v57 = vrot.slane %v1457_v47, 2  ;;  %v269_v58 = vld [vmem:[%s1835_s1 + $0xe0] sm:$0xff]  ;;  %v270_v59 = vld [vmem:[%s1835_s1 + $0xe8] sm:$0xff] }
  0x13   : > { %1152 = vmatpush3.bf16.msra.mxu1 %v1149_v27  ;;  %v232_v60 = vsel %vm229_vm0, %v230_v51, %v231_v52  ;;  %v1131_v63 = vpack.c.bf16 %v252_v56, %v251_v55  ;;  %v285_v0 = vld [vmem:[%s1835_s1 + $0x160] sm:$0xff]  ;;  %v286_v1 = vld [vmem:[%s1835_s1 + $0x168] sm:$0xff]  ;;  %v1133_v2 = vpack.c.bf16 %v270_v59, %v269_v58  ;;  %v271_v5 = vld [vmem:[%s1835_s1 + $0xf0] sm:$0xff] }
  0x14   : > { %1154 = vmatprep.subr.bf16.mxu1 %v1153_v36  ;;  %360 = vmatprep.mubr.f32.mxu0 %v232_v60  ;;  %v238_v62 = vsel %vm235_vm1, %v236_v53, %v1477_v57  ;;  %v253_v3 = vld [vmem:[%s1835_s1 + $0x60] sm:$0xff]  ;;  %v254_v4 = vld [vmem:[%s1835_s1 + $0x68] sm:$0xff]  ;;  %v272_v6 = vld [vmem:[%s1835_s1 + $0xf8] sm:$0xff]  ;;  %v1165_v7 = vpack.c.bf16 %v286_v1, %v285_v0 }
  0x15   : > { %1124 = vmatpush3.bf16.msra.mxu0 %v1123_v37  ;;  %1106 = vmatprep.mubr.f32.mxu1 %v238_v62  ;;  %v1135_v8 = vpack.c.bf16 %v254_v4, %v253_v3  ;;  %v287_v9 = vld [vmem:[%s1835_s1 + $0x170] sm:$0xff]  ;;  %v288_v10 = vld [vmem:[%s1835_s1 + $0x178] sm:$0xff]  ;;  %v1137_v11 = vpack.c.bf16 %v272_v6, %v271_v5  ;;  %v518_v14 = vld [vmem:[%s1837_s3 + $0x80] sm:$0xff] }
  0x16   : > { %1126 = vmatprep.subr.bf16.mxu0 %v1125_v40  ;;  %v255_v12 = vld [vmem:[%s1835_s1 + $0x70] sm:$0xff]  ;;  %v256_v13 = vld [vmem:[%s1835_s1 + $0x78] sm:$0xff]  ;;  %v519_v15 = vld [vmem:[%s1837_s3 + $0x88] sm:$0xff]  ;;  %v1169_v16 = vpack.c.bf16 %v288_v10, %v287_v9 }
  0x17   : > { %1156 = vmatpush3.bf16.msra.mxu1 %v1153_v36  ;;  %v1139_v17 = vpack.c.bf16 %v256_v13, %v255_v12  ;;  %v550_v18 = vld [vmem:[%s1837_s3 + $0x180] sm:$0xff]  ;;  %v551_v19 = vld [vmem:[%s1837_s3 + $0x188] sm:$0xff]  ;;  %v1173_v20 = vpack.c.bf16 %v519_v15, %v518_v14  ;;  %v520_v23 = vld [vmem:[%s1837_s3 + $0x90] sm:$0xff] }
  0x18   : > { %1158 = vmatprep.subr.bf16.mxu1 %v1157_v45  ;;  %v502_v21 = vld [vmem:[%s1837_s3] sm:$0xff]  ;;  %v503_v22 = vld [vmem:[%s1837_s3 + $0x8] sm:$0xff]  ;;  %v521_v24 = vld [vmem:[%s1837_s3 + $0x98] sm:$0xff]  ;;  %v1205_v25 = vpack.c.bf16 %v551_v19, %v550_v18 }
  0x19   : > { %1128 = vmatpush3.bf16.msra.mxu0 %v1127_v48  ;;  %v534_v26 = vld [vmem:[%s1837_s3 + $0x100] sm:$0xff]  ;;  %v535_v27 = vld [vmem:[%s1837_s3 + $0x108] sm:$0xff]  ;;  %v1175_v28 = vpack.c.bf16 %v503_v22, %v502_v21  ;;  %v1177_v29 = vpack.c.bf16 %v521_v24, %v520_v23  ;;  %v504_v30 = vld [vmem:[%s1837_s3 + $0x10] sm:$0xff] }
  0x1a   : > { %1130 = vmatprep.subr.bf16.mxu0 %v1129_v54  ;;  %v505_v31 = vld [vmem:[%s1837_s3 + $0x18] sm:$0xff]  ;;  %v522_v32 = vld [vmem:[%s1837_s3 + $0xa0] sm:$0xff]  ;;  %v523_v33 = vld [vmem:[%s1837_s3 + $0xa8] sm:$0xff]  ;;  %v1207_v34 = vpack.c.bf16 %v535_v27, %v534_v26  ;;  %v1302_v26 = vmov 0.0  }
  0x1b   : > { %1160 = vmatpush3.bf16.msra.mxu1 %v1157_v45  ;;  %v1179_v35 = vpack.c.bf16 %v505_v31, %v504_v30  ;;  %v1181_v36 = vpack.c.bf16 %v523_v33, %v522_v32  ;;  %v506_v37 = vld [vmem:[%s1837_s3 + $0x20] sm:$0xff]  ;;  %v507_v38 = vld [vmem:[%s1837_s3 + $0x28] sm:$0xff]  ;;  %v524_v40 = vld [vmem:[%s1837_s3 + $0xb0] sm:$0xff]  ;;  %450 = vst [vmem:[#allocation2 + $0x8] sm:$0x1] %v1302_v26 }
  0x1c   : > { %1162 = vmatprep.subr.bf16.mxu1 %v1161_v61  ;;  %v1183_v39 = vpack.c.bf16 %v507_v38, %v506_v37  ;;  %v525_v41 = vld [vmem:[%s1837_s3 + $0xb8] sm:$0xff]  ;;  %v552_v42 = vld [vmem:[%s1837_s3 + $0x190] sm:$0xff]  ;;  %v526_v53 = vld [vmem:[%s1837_s3 + $0xc0] sm:$0xff]  ;;  %451 = vst [vmem:[#allocation2 + $0x1f] sm:$0x1] %v1302_v26 }
  0x1d   : > { %1132 = vmatpush3.bf16.msra.mxu0 %v1131_v63  ;;  %v1185_v43 = vpack.c.bf16 %v525_v41, %v524_v40  ;;  %v553_v44 = vld [vmem:[%s1837_s3 + $0x198] sm:$0xff]  ;;  %v508_v45 = vld [vmem:[%s1837_s3 + $0x30] sm:$0xff]  ;;  %v527_v54 = vld [vmem:[%s1837_s3 + $0xc8] sm:$0xff] }
  0x1e   : > { %1134 = vmatprep.subr.bf16.mxu0 %v1133_v2  ;;  %v1209_v48 = vpack.c.bf16 %v553_v44, %v552_v42  ;;  %v536_v50 = vld [vmem:[%s1837_s3 + $0x110] sm:$0xff]  ;;  %v537_v51 = vld [vmem:[%s1837_s3 + $0x118] sm:$0xff]  ;;  %v554_v55 = vld [vmem:[%s1837_s3 + $0x1a0] sm:$0xff]  ;;  %v1189_v56 = vpack.c.bf16 %v527_v54, %v526_v53 }
  0x1f   : > { %1164 = vmatpush3.bf16.msra.mxu1 %v1161_v61  ;;  %v555_v58 = vld [vmem:[%s1837_s3 + $0x1a8] sm:$0xff]  ;;  %v510_v59 = vld [vmem:[%s1837_s3 + $0x40] sm:$0xff]  ;;  %v528_v2 = vld [vmem:[%s1837_s3 + $0xd0] sm:$0xff] }
  0x20   : > { %1166 = vmatprep.subr.bf16.mxu1 %v1165_v7  ;;  %v511_v60 = vld [vmem:[%s1837_s3 + $0x48] sm:$0xff]  ;;  %v1213_v61 = vpack.c.bf16 %v555_v58, %v554_v55  ;;  %v538_v63 = vld [vmem:[%s1837_s3 + $0x120] sm:$0xff]  ;;  %v529_v3 = vld [vmem:[%s1837_s3 + $0xd8] sm:$0xff] }
  0x21   : > { %1136 = vmatpush3.bf16.msra.mxu0 %v1135_v8  ;;  %v1191_v62 = vpack.c.bf16 %v511_v60, %v510_v59  ;;  %v539_v0 = vld [vmem:[%s1837_s3 + $0x128] sm:$0xff]  ;;  %v556_v4 = vld [vmem:[%s1837_s3 + $0x1b0] sm:$0xff]  ;;  %v1193_v5 = vpack.c.bf16 %v529_v3, %v528_v2  ;;  %v557_v6 = vld [vmem:[%s1837_s3 + $0x1b8] sm:$0xff] }
  0x22   : > { %1138 = vmatprep.subr.bf16.mxu0 %v1137_v11  ;;  %v1215_v1 = vpack.c.bf16 %v539_v0, %v538_v63  ;;  %v513_v8 = vld [vmem:[%s1837_s3 + $0x58] sm:$0xff]  ;;  %v1217_v9 = vpack.c.bf16 %v557_v6, %v556_v4  ;;  %v540_v11 = vld [vmem:[%s1837_s3 + $0x130] sm:$0xff]  ;;  %v530_v14 = vld [vmem:[%s1837_s3 + $0xe0] sm:$0xff] }
  0x23   : > { %1168 = vmatpush3.bf16.msra.mxu1 %v1165_v7  ;;  %v512_v7 = vld [vmem:[%s1837_s3 + $0x50] sm:$0xff]  ;;  %v541_v12 = vld [vmem:[%s1837_s3 + $0x138] sm:$0xff]  ;;  %v531_v15 = vld [vmem:[%s1837_s3 + $0xe8] sm:$0xff] }
  0x24   : > { %1170 = vmatprep.subr.bf16.mxu1 %v1169_v16  ;;  %v1195_v10 = vpack.c.bf16 %v513_v8, %v512_v7  ;;  %v1219_v13 = vpack.c.bf16 %v541_v12, %v540_v11  ;;  %v559_v18 = vld [vmem:[%s1837_s3 + $0x1c8] sm:$0xff]  ;;  %v514_v19 = vld [vmem:[%s1837_s3 + $0x60] sm:$0xff]  ;;  %v532_v27 = vld [vmem:[%s1837_s3 + $0xf0] sm:$0xff] }
  0x25   : > { %1140 = vmatpush3.bf16.msra.mxu0 %v1139_v17  ;;  %v1197_v17 = vpack.c.bf16 %v531_v15, %v530_v14  ;;  %v542_v23 = vld [vmem:[%s1837_s3 + $0x140] sm:$0xff]  ;;  %v543_v24 = vld [vmem:[%s1837_s3 + $0x148] sm:$0xff]  ;;  %v561_v31 = vld [vmem:[%s1837_s3 + $0x1d8] sm:$0xff] }
  0x26   : > { %1174 = vmatprep.subr.bf16.mxu0 %v1173_v20  ;;  %v515_v20 = vld [vmem:[%s1837_s3 + $0x68] sm:$0xff]  ;;  %v516_v32 = vld [vmem:[%s1837_s3 + $0x70] sm:$0xff]  ;;  %v517_v33 = vld [vmem:[%s1837_s3 + $0x78] sm:$0xff] }
  0x27   : > { %1172 = vmatpush3.bf16.msra.mxu1 %v1169_v16  ;;  %v558_v16 = vld [vmem:[%s1837_s3 + $0x1c0] sm:$0xff]  ;;  %v1199_v22 = vpack.c.bf16 %v515_v20, %v514_v19  ;;  %v545_v37 = vld [vmem:[%s1837_s3 + $0x158] sm:$0xff]  ;;  %v563_v40 = vld [vmem:[%s1837_s3 + $0x1e8] sm:$0xff] }
  0x28   : > { %361 = vmatmul.mubr.f32.vlgmr.msra.gmra.mrb[0].mxu0 %v1455_v46  ;;  %1206 = vmatprep.subr.bf16.mxu1 %v1205_v25  ;;  %v1221_v21 = vpack.c.bf16 %v559_v18, %v558_v16  ;;  %v1223_v25 = vpack.c.bf16 %v543_v24, %v542_v23  ;;  %v582_v41 = vld [vmem:[%s1837_s3 + $0x280] sm:$0xff]  ;;  %v549_v53 = vld [vmem:[%s1837_s3 + $0x178] sm:$0xff]  ;;  %v584_v12 = vld [vmem:[%s1837_s3 + $0x290] sm:$0xff] }
  0x29   : > { %365 = vmatprep.mubr.f32.mxu0 %v231_v52  ;;  %1176 = vmatpush3.bf16.msra.mxu0 %v1175_v28  ;;  %v1211_v52 = vpack.c.bf16 %v537_v51, %v536_v50  ;;  %v533_v28 = vld [vmem:[%s1837_s3 + $0xf8] sm:$0xff]  ;;  %v546_v44 = vld [vmem:[%s1837_s3 + $0x160] sm:$0xff]  ;;  %v568_v15 = vld [vmem:[%s1837_s3 + $0x210] sm:$0xff] }
  0x2a   : > { %1107 = vmatmul.mubr.f32.vlgmr.msra.gmra.mrb[0].mxu1 %v1477_v57  ;;  %1178 = vmatprep.subr.bf16.mxu0 %v1177_v29  ;;  %v560_v29 = vld [vmem:[%s1837_s3 + $0x1d0] sm:$0xff]  ;;  %v1201_v30 = vpack.c.bf16 %v533_v28, %v532_v27  ;;  %v565_v50 = vld [vmem:[%s1837_s3 + $0x1f8] sm:$0xff]  ;;  %v898_v58 = vld [vmem:[%s1836_s2] ss:$0 sm:$0xff] }
  0x2b   : > { %1208 = vmatpush3.bf16.msra.mxu1 %v1207_v34  ;;  %v1225_v34 = vpack.c.bf16 %v561_v31, %v560_v29  ;;  %v569_v16 = vld [vmem:[%s1837_s3 + $0x218] sm:$0xff]  ;;  %v466_v19 = vld [vmem:[#allocation2] sm:$0xfe]  ;;  %v468_v20 = vld [vmem:[#allocation2 + $0x10] sm:$0x7f] }
  0x2c   : > { %366 = vmatmul.mubr.f32.gmra.mrb[2].mxu0 %v1457_v47  ;;  %v509_v47 = vld [vmem:[%s1837_s3 + $0x38] sm:$0xff]  ;;  %1210 = vmatprep.subr.bf16.mxu1 %v1209_v48  ;;  %v1243_v23 = vpack.c.bf16 %v569_v16, %v568_v15  ;;  %v478_v26 = vrot.slane %v466_v19, 1  ;;  %v479_v27 = vrot.slane %v468_v20, 1  ;;  %v464_v28 = vld [vmem:[#allocation2 + $0x10] sm:$0x3f]  ;;  %v571_v31 = vld [vmem:[%s1837_s3 + $0x228] sm:$0xff] }
  0x2d   : > { %1180 = vmatpush3.bf16.msra.mxu0 %v1179_v35  ;;  %v1187_v49 = vpack.c.bf16 %v509_v47, %v508_v45  ;;  %v1203_v35 = vpack.c.bf16 %v517_v33, %v516_v32  ;;  %v547_v45 = vld [vmem:[%s1837_s3 + $0x168] sm:$0xff]  ;;  %v899_v16 = vld [vmem:[%s1838_s4] ss:$0 sm:$0xff] }
  0x2e   : > { %1182 = vmatprep.subr.bf16.mxu0 %v1181_v36  ;;  %v544_v36 = vld [vmem:[%s1837_s3 + $0x150] sm:$0xff]  ;;  %v1231_v48 = vpack.c.bf16 %v547_v45, %v546_v44  ;;  %v573_v45 = vld [vmem:[%s1837_s3 + $0x238] sm:$0xff] }
  0x2f   : > { %1212 = vmatpush3.bf16.msra.mxu1 %v1211_v52  ;;  %v1227_v38 = vpack.c.bf16 %v545_v37, %v544_v36  ;;  %v548_v52 = vld [vmem:[%s1837_s3 + $0x170] sm:$0xff] }
  0x30   : > { %1214 = vmatprep.subr.bf16.mxu1 %v1213_v61  ;;  %v1235_v54 = vpack.c.bf16 %v549_v53, %v548_v52  ;;  %v572_v44 = vld [vmem:[%s1837_s3 + $0x230] sm:$0xff]  ;;  %v575_v52 = vld [vmem:[%s1837_s3 + $0x248] sm:$0xff] }
  0x31   : > { %1184 = vmatpush3.bf16.msra.mxu0 %v1183_v39  ;;  %v562_v39 = vld [vmem:[%s1837_s3 + $0x1e0] sm:$0xff] }
  0x32   : > { %1186 = vmatprep.subr.bf16.mxu0 %v1185_v43  ;;  %v1229_v42 = vpack.c.bf16 %v563_v40, %v562_v39  ;;  %v583_v43 = vld [vmem:[%s1837_s3 + $0x288] sm:$0xff]  ;;  %v589_v39 = vld [vmem:[%s1837_s3 + $0x2b8] sm:$0xff]  ;;  %v480_v40 = vsel %vm229_vm0, %v478_v26, %v479_v27 }
  0x33   : > { %1216 = vmatpush3.bf16.msra.mxu1 %v1215_v1  ;;  %v1237_v47 = vpack.c.bf16 %v583_v43, %v582_v41 }
  0x34   : > { %1218 = vmatprep.subr.bf16.mxu1 %v1217_v9  ;;  %v566_v9 = vld [vmem:[%s1837_s3 + $0x200] sm:$0xff] }
  0x35   : > { %1188 = vmatpush3.bf16.msra.mxu0 %v1187_v49  ;;  %v564_v49 = vld [vmem:[%s1837_s3 + $0x1f0] sm:$0xff] }
  0x36   : > { %1190 = vmatprep.subr.bf16.mxu0 %v1189_v56  ;;  %v1233_v51 = vpack.c.bf16 %v565_v50, %v564_v49  ;;  %v591_v49 = vld [vmem:[%s1837_s3 + $0x2c8] sm:$0xff]  ;;  %v1251_v50 = vpack.c.bf16 %v573_v45, %v572_v44 }
  0x37   : > { %1220 = vmatpush3.bf16.msra.mxu1 %v1219_v13  ;;  %v585_v13 = vld [vmem:[%s1837_s3 + $0x298] sm:$0xff] }
  0x38   : > { %1222 = vmatprep.subr.bf16.mxu1 %v1221_v21  ;;  %v1241_v18 = vpack.c.bf16 %v585_v13, %v584_v12  ;;  %v586_v21 = vld [vmem:[%s1837_s3 + $0x2a0] sm:$0xff] }
  0x39   : > { %1192 = vmatpush3.bf16.msra.mxu0 %v1191_v62 }
  0x3a   : > { %1194 = vmatprep.subr.bf16.mxu0 %v1193_v5 }
  0x3b   : > { %1224 = vmatpush3.bf16.msra.mxu1 %v1223_v25 }
  0x3c   : > { %1226 = vmatprep.subr.bf16.mxu1 %v1225_v34 }
  0x3d   : > { %1196 = vmatpush3.bf16.msra.mxu0 %v1195_v10  ;;  %v567_v10 = vld [vmem:[%s1837_s3 + $0x208] sm:$0xff] }
  0x3e   : > { %1198 = vmatprep.subr.bf16.mxu0 %v1197_v17  ;;  %v1239_v14 = vpack.c.bf16 %v567_v10, %v566_v9  ;;  %v581_v9 = vld [vmem:[%s1837_s3 + $0x278] sm:$0xff] }
  0x3f   : > { %1228 = vmatpush3.bf16.msra.mxu1 %v1227_v38  ;;  %v588_v38 = vld [vmem:[%s1837_s3 + $0x2b0] sm:$0xff] }
  0x40   : > { %1230 = vmatprep.subr.bf16.mxu1 %v1229_v42 }
  0x41   : > { %1200 = vmatpush3.bf16.msra.mxu0 %v1199_v22  ;;  %v587_v22 = vld [vmem:[%s1837_s3 + $0x2a8] sm:$0xff] }
  0x42   : > { %1202 = vmatprep.subr.bf16.mxu0 %v1201_v30  ;;  %v1245_v29 = vpack.c.bf16 %v587_v22, %v586_v21  ;;  %v570_v30 = vld [vmem:[%s1837_s3 + $0x220] sm:$0xff] }
  0x43   : > { %1232 = vmatpush3.bf16.msra.mxu1 %v1231_v48  ;;  %v1247_v41 = vpack.c.bf16 %v571_v31, %v570_v30  ;;  %v590_v48 = vld [vmem:[%s1837_s3 + $0x2c0] sm:$0xff] }
  0x44   : > { %1234 = vmatprep.subr.bf16.mxu1 %v1233_v51  ;;  %v574_v51 = vld [vmem:[%s1837_s3 + $0x240] sm:$0xff]  ;;  %v1253_v53 = vpack.c.bf16 %v591_v49, %v590_v48 }
  0x45   : > { %1204 = vmatpush3.bf16.msra.mxu0 %v1203_v35 }
  0x46   : > { %1238 = vmatprep.subr.bf16.mxu0 %v1237_v47 }
  0x47   : > { %1236 = vmatpush3.bf16.msra.mxu1 %v1235_v54  ;;  %v592_v54 = vld [vmem:[%s1837_s3 + $0x2d0] sm:$0xff] }
  0x48   : > { %1269 = vmatprep.subr.bf16.mxu1 %v1237_v47  ;;  %v1249_v47 = vpack.c.bf16 %v589_v39, %v588_v38 }
  0xfb   : > { %v936_v55 = vpop.f32.mrb[0].mxu0 }
  0xfc   : > { %v937_v56 = vpop.f32.mrb[1].mxu0 }
  0xfd   : > { %v938_v59 = vadd.f32 %v937_v56, %v936_v55  ;;  %v1108_v60 = vpop.f32.mrb[0].mxu1  ;;  %v593_v55 = vld [vmem:[%s1837_s3 + $0x2d8] sm:$0xff]  ;;  %v1255_v56 = vpack.c.bf16 %v575_v52, %v574_v51 }
  0xfe   : > { %v437_v61 = vpop.f32.mrb[1].mxu1 }
  0xff   : > { %v939_v62 = vpop.f32.mrb[2].mxu0  ;;  %v363_v63 = vadd.f32 %v938_v59, %v898_v58  ;;  %v576_v59 = vld [vmem:[%s1837_s3 + $0x250] sm:$0xff] }
 0x100   : > { %v940_v0 = vpop.f32.mrb[3].mxu0 }
 0x101   : > { %v941_v1 = vadd.f32 %v940_v0, %v939_v62  ;;  %v438_v2 = vadd.f32 %v437_v61, %v363_v63  ;;  %v594_v61 = vld [vmem:[%s1837_s3 + $0x2e0] sm:$0xff]  ;;  %v595_v62 = vld [vmem:[%s1837_s3 + $0x2e8] sm:$0xff] }
 0x102   : > { %v1261_v0 = vpack.c.bf16 %v595_v62, %v594_v61 }
 0x103   : > { %v368_v3 = vadd.f32 %v941_v1, %v898_v58  ;;  %v446_v4 = vmax.f32 %v438_v2, 0.0  ;;  %v1257_v58 = vpack.c.bf16 %v593_v55, %v592_v54  ;;  %v578_v1 = vld [vmem:[%s1837_s3 + $0x260] sm:$0xff]  ;;  %v579_v2 = vld [vmem:[%s1837_s3 + $0x268] sm:$0xff] }
 0x105   : > { %v443_v5 = vadd.f32 %v1108_v60, %v368_v3  ;;  %v455_v6 = vrot.slane %v446_v4, 7  ;;  %v577_v60 = vld [vmem:[%s1837_s3 + $0x258] sm:$0xff]  ;;  %v596_v3 = vld [vmem:[%s1837_s3 + $0x2f0] sm:$0xff] }
 0x106   : > { %v1259_v63 = vpack.c.bf16 %v577_v60, %v576_v59  ;;  %v597_v4 = vld [vmem:[%s1837_s3 + $0x2f8] sm:$0xff] }
 0x107   : > { %v447_v7 = vmax.f32 %v443_v5, 0.0  ;;  %460 = vst [vmem:[#allocation2 + $0x8] sm:$0xfe] %v455_v6  ;;  %v1263_v5 = vpack.c.bf16 %v579_v2, %v578_v1 }
 0x109   : > { %v456_v8 = vrot.slane %v447_v7, 7  ;;  %v1265_v7 = vpack.c.bf16 %v597_v4, %v596_v3 }
 0x10b   : > { %v457_v11 = vsel %vm454_vm2, %v455_v6, %v456_v8  ;;  %v470_v6 = vld [vmem:[#allocation2] sm:$0xfc]  ;;  %v580_v8 = vld [vmem:[%s1837_s3 + $0x270] sm:$0xff] }
 0x10c   : > { %461 = vst [vmem:[#allocation2 + $0x18] sm:$0x7f] %v457_v11  ;;  %v492_v10 = vrot.slane %v470_v6, 2  ;;  %v1267_v11 = vpack.c.bf16 %v581_v9, %v580_v8 }
 0x10e   : > { %v463_v17 = vld [vmem:[#allocation2 + $0x8] sm:$0xff]  ;;  %v494_v12 = vsel %vm235_vm1, %v492_v10, %v1477_v57 }
 0x10f   : > { %669 = vmatprep.mubr.f32.mxu0 %v463_v17  ;;  %v467_v24 = vld [vmem:[#allocation2 + $0x8] sm:$0xfe] }
 0x110   : > { %670 = vmatmul.mubr.f32.vlgmr.msra.gmra.mrb[4].mxu0 %v1455_v46  ;;  %v471_v25 = vld [vmem:[#allocation2 + $0x8] sm:$0xfc]  ;;  %v481_v34 = vrot.slane %v467_v24, 1 }
 0x111   : > { %1240 = vmatpush3.bf16.msra.mxu0 %v1239_v14  ;;  %v495_v36 = vrot.slane %v471_v25, 2 }
 0x112   : > { %1242 = vmatprep.subr.bf16.mxu0 %v1241_v18 }
 0x113   : > { %v465_v32 = vld [vmem:[#allocation2 + $0x18] sm:$0x3f] }
 0x114   : > { %v469_v33 = vld [vmem:[#allocation2 + $0x18] sm:$0x7f]  ;;  %674 = vmatprep.mubr.f32.mxu0 %v465_v32 }
 0x115   : > { %v473_v46 = vld [vmem:[#allocation2 + $0x18] sm:$0xff]  ;;  %v482_v35 = vrot.slane %v469_v33, 1  ;;  %1244 = vmatpush3.bf16.msra.mxu0 %v1243_v23 }
 0x116   : > { %v496_v37 = vrot.slane %v473_v46, 2  ;;  %675 = vmatmul.mubr.f32.gmra.mrb[6].mxu0 %v464_v28  ;;  %1246 = vmatprep.subr.bf16.mxu0 %v1245_v29 }
 0x117   : > { %v483_v42 = vsel %vm229_vm0, %v481_v34, %v482_v35 }
 0x118   : > { %v497_v43 = vsel %vm235_vm1, %v495_v36, %v496_v37  ;;  %744 = vmatprep.mubr.f32.mxu1 %v483_v42 }
 0x119   : > { %819 = vmatprep.mubr.f32.mxu0 %v497_v43  ;;  %745 = vmatmul.mubr.f32.vlgmr.msra.gmra.mrb[2].mxu1 %v480_v40 }
 0x11a   : > { %1277 = vmatpush3.bf16.msra.mxu1 %v1239_v14  ;;  %1248 = vmatpush3.bf16.msra.mxu0 %v1247_v41 }
 0x11b   : > { %749 = vmatprep.mubr.f32.mxu1 %v482_v35  ;;  %1270 = vmatprep.subr.bf16.mxu1 %v1241_v18 }
 0x11c   : > { %1250 = vmatprep.subr.bf16.mxu0 %v1249_v47 }
 0x11d   : > { %750 = vmatmul.mubr.f32.gmra.mrb[4].mxu1 %v479_v27 }
 0x11e   : > { %1278 = vmatpush3.bf16.msra.mxu1 %v1243_v23  ;;  %1252 = vmatpush3.bf16.msra.mxu0 %v1251_v50 }
 0x11f   : > { %824 = vmatprep.mubr.f32.mxu1 %v496_v37  ;;  %1271 = vmatprep.subr.bf16.mxu1 %v1245_v29 }
 0x120   : > { %1254 = vmatprep.subr.bf16.mxu0 %v1253_v53 }
 0x122   : > { %1279 = vmatpush3.bf16.msra.mxu1 %v1247_v41  ;;  %1256 = vmatpush3.bf16.msra.mxu0 %v1255_v56 }
 0x123   : > { %1272 = vmatprep.subr.bf16.mxu1 %v1249_v47  ;;  %1258 = vmatprep.subr.bf16.mxu0 %v1257_v58 }
 0x126   : > { %1280 = vmatpush3.bf16.msra.mxu1 %v1251_v50  ;;  %1260 = vmatpush3.bf16.msra.mxu0 %v1259_v63 }
 0x127   : > { %1273 = vmatprep.subr.bf16.mxu1 %v1253_v53  ;;  %1262 = vmatprep.subr.bf16.mxu0 %v1261_v0 }
 0x12a   : > { %1281 = vmatpush3.bf16.msra.mxu1 %v1255_v56  ;;  %1264 = vmatpush3.bf16.msra.mxu0 %v1263_v5 }
 0x12b   : > { %1274 = vmatprep.subr.bf16.mxu1 %v1257_v58  ;;  %1266 = vmatprep.subr.bf16.mxu0 %v1265_v7 }
 0x12e   : > { %1282 = vmatpush3.bf16.msra.mxu1 %v1259_v63  ;;  %1268 = vmatpush3.bf16.msra.mxu0 %v1267_v11 }
 0x12f   : > { %1275 = vmatprep.subr.bf16.mxu1 %v1261_v0 }
 0x131   : > { %820 = vmatmul.mubr.f32.vlgmr.msra.gmra.mrb[8].mxu0 %v494_v12 }
 0x132   : > { %1283 = vmatpush3.bf16.msra.mxu1 %v1263_v5 }
 0x133   : > { %1276 = vmatprep.subr.bf16.mxu1 %v1265_v7 }
 0x136   : > { %1284 = vmatpush3.bf16.msra.mxu1 %v1267_v11 }
 0x139   : > { %825 = vmatmul.mubr.f32.vlgmr.msra.gmra.mrb[6].mxu1 %v1477_v57 }
 0x1e3   : > { %v992_v13 = vpop.f32.mrb[4].mxu0 }
 0x1e4   : > { %v993_v14 = vpop.f32.mrb[5].mxu0 }
 0x1e5   : > { %v994_v15 = vadd.f32 %v993_v14, %v992_v13 }
 0x1e7   : > { %v672_v19 = vadd.f32 %v994_v15, %v899_v16 }
 0x1e9   : > { %v995_v17 = vpop.f32.mrb[6].mxu0 }
 0x1ea   : > { %v996_v18 = vpop.f32.mrb[7].mxu0 }
 0x1eb   : > { %v997_v21 = vadd.f32 %v996_v18, %v995_v17 }
 0x1ec   : > { %v1030_v20 = vpop.f32.mrb[2].mxu1 }
 0x1ed   : > { %v1031_v22 = vpop.f32.mrb[3].mxu1  ;;  %v677_v25 = vadd.f32 %v997_v21, %v899_v16 }
 0x1ee   : > { %v1032_v23 = vadd.f32 %v1031_v22, %v1030_v20 }
 0x1f0   : > { %v747_v24 = vadd.f32 %v1032_v23, %v672_v19  ;;  %v1033_v26 = vpop.f32.mrb[4].mxu1 }
 0x1f1   : > { %v1034_v27 = vpop.f32.mrb[5].mxu1 }
 0x1f2   : > { %v1035_v57 = vadd.f32 %v1034_v27, %v1033_v26 }
 0x1f4   : > { %v752_v28 = vadd.f32 %v1035_v57, %v677_v25 }
 0x204   : > { %v1068_v29 = vpop.f32.mrb[8].mxu0 }
 0x205   : > { %v1069_v30 = vpop.f32.mrb[9].mxu0 }
 0x206   : > { %v1070_v31 = vadd.f32 %v1069_v30, %v1068_v29 }
 0x208   : > { %v822_v32 = vadd.f32 %v1070_v31, %v747_v24 }
 0x20a   : > { %v830_v33 = vmax.f32 %v822_v32, 0.0 }
 0x20c   : > { %832 = vst [vmem:[%s224_s6] sm:$0xff] %v830_v33  ;;  %v1071_v46 = vpop.f32.mrb[6].mxu1 }
 0x20d   : > { %v1072_v34 = vpop.f32.mrb[7].mxu1 }
 0x20e   : > { %v1073_v35 = vadd.f32 %v1072_v34, %v1071_v46 }
 0x210   : > { %v827_v36 = vadd.f32 %v1073_v35, %v752_v28 }
 0x212   : > { %v831_v37 = vmax.f32 %v827_v36, 0.0 }
 0x214   : > { %833 = vst [vmem:[%s224_s6 + $0x8] sm:$0x3f] %v831_v37 }
 0x215 PF: > { %s15_s18 = sadd.s32 1, %s1300_s18  }
 0x216   : > { %p12_p4 = scmp.ge.s32.totalorder %s15_s18, 4  }
 0x218   :  { %14 = sbr.rel (!%p12_p4) target bundleno = 1 (0x1), region = 70 }

</bundles_post_ra>
